<compile_context>
chip_gen: v5e
topology: v5e:2x2
jax: 0.10.0
libtpu: 0.0.40
codegen_flags: <defaults>
</compile_context>

<pallas_src>
import jax
import jax.numpy as jnp
from jax.experimental import pallas as pl
from jax.experimental.pallas import tpu as pltpu

H1, H2 = 8, 2       # dense_model1 default deep_layers = [i_size, 8, 2]
SP_ROWS = 24        # fused small-param slab: 16 (w2) + 2 (b2) + 2 (w3) + 1 (b3) -> pad to 24


def _round_up(x, m):
    return ((x + m - 1) // m) * m


def _choose_group_tile(G, tg_max, gc):
    """Group tile: as large as requested, but keep >=2 'parallel' blocks when
    G allows so both v7x TensorCores get work."""
    tg = max(gc, (tg_max // gc) * gc)
    while tg > gc and _round_up(G, tg) // tg < 2:
        tg -= gc
    return tg


def _make_kernel(gc, ncc):
    """Kernel for one (tb batch rows) x (tg = ncc*gc groups) block."""

    def kernel(x_ref, w1_ref, sp_ref, o_ref):
        x = x_ref[...]                                   # (tb, F+1) bf16, last col == 1.0

        # Process the tg-wide block in 128-lane group chunks to bound live vregs.
        for c in range(ncc):                             # small static unroll
            lo = c * gc

            # --- layer 1 (F -> 8): ONE fused MXU matmul for all 8 hidden units
            # of this gc-group chunk; bias folded via the ones column; f32 acc.
            w1c = w1_ref[:, c * H1 * gc:(c + 1) * H1 * gc]            # (F+1, H1*gc) bf16
            h1 = jnp.dot(x, w1c, preferred_element_type=jnp.float32)  # (tb, H1*gc) f32
            h1 = jnp.maximum(h1, 0.0)
            # column layout inside the chunk: hidden unit k lives at lanes [k*gc, (k+1)*gc)

            # --- layers 2 (8 -> 2) and 3 (2 -> 1): unrolled f32 VPU MACs over
            # the lane-dense groups-on-lanes layout (v5e-safe f32 math).
            # Small params are read row-by-row from the fused (24, tg) slab:
            #   rows 0..15: w2[k, j] at row k*H2 + j
            #   rows 16..17: b2[j];  rows 18..19: w3[j];  row 20: b3
            def prow(r):
                return sp_ref[r:r + 1, lo:lo + gc]       # (1, gc), broadcasts over batch

            out = prow(20)                               # b3
            for j in range(H2):
                acc = prow(16 + j)                       # b2[j]
                for k in range(H1):
                    acc = acc + h1[:, k * gc:(k + 1) * gc] * prow(k * H2 + j)
                out = out + jnp.maximum(acc, 0.0) * prow(18 + j)

            # lane-dense, 128-aligned store into the (tb, tg) output block
            o_ref[:, lo:lo + gc] = out.astype(o_ref.dtype)

    return kernel


def pack_params(params, tg=512, gc=128, w1_dtype=jnp.bfloat16):
    """One-time repack of the per-group weights (hoist out of the hot path).

    Returns a dict with:
      w1f : (F+1, H1*Gp) w1_dtype — layer-1 weights + bias row, chunk-major so a
            (F+1, H1*tg) BlockSpec block is one contiguous fused-MXU slab and the
            per-hidden-unit sub-slabs sit at 128-aligned lane offsets.
      sp  : (24, Gp) f32 — fused w2/b2/w3/b3 slab.
    """
    w1, b1, w2, b2, w3, b3 = params
    G, F, _ = w1.shape
    gc = max(128, (gc // 128) * 128)
    tg = _choose_group_tile(G, tg, gc)
    Gp = _round_up(G, tg)
    padg = Gp - G

    # --- fused W1 (+ bias) slab, bf16 for the MXU / halved HBM traffic.
    w1a = jnp.concatenate([w1, b1], axis=1)              # (G, F+1, H1)
    if padg:
        w1a = jnp.pad(w1a, ((0, padg), (0, 0), (0, 0)))
    nck = Gp // gc
    w1f = (w1a.reshape(nck, gc, F + 1, H1)
              .transpose(2, 0, 3, 1)                     # (F+1, nck, H1, gc)
              .reshape(F + 1, nck * H1 * gc)
              .astype(w1_dtype))

    # --- fused small-param slab (kept f32: v5e has no bf16 VPU math).
    w2r = w2.reshape(G, H1 * H2).T                       # (16, G), row = k*H2 + j
    b2r = b2[:, 0, :].T                                  # (2, G)
    w3r = w3[:, :, 0].T                                  # (2, G)
    b3r = b3[:, 0, :].T                                  # (1, G)
    sp = jnp.concatenate(
        [w2r, b2r, w3r, b3r, jnp.zeros((SP_ROWS - 21, G), jnp.float32)],
        axis=0).astype(jnp.float32)                      # (24, G)
    if padg:
        sp = jnp.pad(sp, ((0, 0), (0, padg)))

    return dict(w1f=w1f, sp=sp, G=G, Gp=Gp, F=F, tg=tg, gc=gc, w1_dtype=w1_dtype)


def gbdt_dense_forward(x, packed, tb=32):
    """x: (B, F) float32; packed: output of pack_params. Returns (B, G) f32."""
    w1f, sp = packed["w1f"], packed["sp"]
    G, Gp, F, tg, gc = packed["G"], packed["Gp"], packed["F"], packed["tg"], packed["gc"]
    B = x.shape[0]
    assert x.shape[1] == F

    # Batch tiling: groups OUTER / batch INNER so weight blocks keep a constant
    # block index across the inner batch steps (no re-DMA of weights).
    Bp8 = _round_up(B, 8)
    if Bp8 <= tb:
        tb_eff, Bp = Bp8, Bp8
    else:
        tb_eff = max(16, (tb // 16) * 16)                # bf16-friendly sublane tile
        Bp = _round_up(Bp8, tb_eff)

    # Fold the layer-1 bias via an appended ones column; cast the MXU lhs to
    # the (bf16) weight dtype.  Accumulation stays f32 inside the kernel.
    x_aug = jnp.concatenate([x, jnp.ones((B, 1), x.dtype)], axis=1)   # (B, F+1)
    if Bp != B:
        x_aug = jnp.pad(x_aug, ((0, Bp - B), (0, 0)))
    x_aug = x_aug.astype(packed["w1_dtype"])

    ncc = tg // gc
    kernel = _make_kernel(gc, ncc)

    out = pl.pallas_call(
        kernel,
        out_shape=jax.ShapeDtypeStruct((Bp, Gp), jnp.float32),
        grid=(Gp // tg, Bp // tb_eff),                   # groups OUTER, batch INNER
        in_specs=[
            pl.BlockSpec((tb_eff, F + 1), lambda g, b: (b, 0)),        # x (bf16)
            pl.BlockSpec((F + 1, H1 * tg), lambda g, b: (0, g)),       # fused W1(+b1), bf16
            pl.BlockSpec((SP_ROWS, tg), lambda g, b: (0, g)),          # fused w2/b2/w3/b3, f32
        ],
        out_specs=pl.BlockSpec((tb_eff, tg), lambda g, b: (b, g)),
        compiler_params=pltpu.CompilerParams(
            dimension_semantics=("parallel", "parallel"),
            vmem_limit_bytes=32 * 1024 * 1024),          # explicit, v7x-safe (64 MiB phys)
    )(x_aug, w1f, sp)

    return out[:B, :G]


def init_params(key, i_size, num_group):
    """Deterministic nn.Linear-style init: U(-1/sqrt(fan_in), 1/sqrt(fan_in)).
    Weights stored as (G, fan_in, fan_out) (transposed vs torch's (out, in))."""
    def linear(k, g, fan_in, fan_out):
        kw, kb = jax.random.split(k)
        bound = 1.0 / (fan_in ** 0.5)
        w = jax.random.uniform(kw, (g, fan_in, fan_out), jnp.float32, -bound, bound)
        b = jax.random.uniform(kb, (g, 1, fan_out), jnp.float32, -bound, bound)
        return w, b

    k1, k2, k3 = jax.random.split(key, 3)
    w1, b1 = linear(k1, num_group, i_size, H1)
    w2, b2 = linear(k2, num_group, H1, H2)
    w3, b3 = linear(k3, num_group, H2, 1)
    return w1, b1, w2, b2, w3, b3


def gbdt_dense_reference(x, params, matmul_dtype=None):
    """Pure-JAX reference of the same forward pass.

    If matmul_dtype is given, x and the layer-1 weights are cast to it before
    the layer-1 matmul (matches the kernel's bf16-MXU / f32-accumulate path)."""
    w1, b1, w2, b2, w3, b3 = params
    hp = jax.lax.Precision.HIGHEST
    if matmul_dtype is not None:
        x = x.astype(matmul_dtype)
        w1 = w1.astype(matmul_dtype)
        b1 = b1.astype(matmul_dtype)
    h1 = jnp.einsum('bf,gfh->gbh', x, w1, precision=hp,
                    preferred_element_type=jnp.float32) + b1.astype(jnp.float32)
    h1 = jnp.maximum(h1, 0.0)
    h2 = jnp.maximum(jnp.einsum('gbh,ghk->gbk', h1, w2, precision=hp) + b2, 0.0)
    o = jnp.einsum('gbk,gko->gbo', h2, w3, precision=hp) + b3     # (G, B, 1)
    return jnp.transpose(o[:, :, 0])                              # (B, G)


if __name__ == "__main__":
    B = 8            # batch
    i_size = 16      # feature size (deep_layers[0])
    num_group = 200  # > 128 so the 'parallel' group axis has >= 2 blocks

    key = jax.random.PRNGKey(0)
    kx, kp = jax.random.split(key)
    x = jax.random.normal(kx, (B, i_size), dtype=jnp.float32)
    params = init_params(kp, i_size, num_group)

    packed = pack_params(params)           # hoisted: packed/cast once, not per call
    out = gbdt_dense_forward(x, packed)
    out = jax.block_until_ready(out)
    assert out.shape == (B, num_group)

    # Strict wiring check vs a reference matching the kernel's bf16 layer-1 numerics.
    ref_bf16 = gbdt_dense_reference(x, params, matmul_dtype=jnp.bfloat16)
    assert jnp.allclose(out, ref_bf16, atol=1e-4, rtol=1e-4), \
        float(jnp.max(jnp.abs(out - ref_bf16)))

    # Semantic check vs the full-f32 module forward (tolerance covers bf16 W1 cast).
    ref_f32 = gbdt_dense_reference(x, params)
    assert jnp.allclose(out, ref_f32, atol=5e-2, rtol=5e-2), \
        float(jnp.max(jnp.abs(out - ref_f32)))

    print("KERNEL_OK")
</pallas_src>

<mosaic_0001>
module attributes {stable_mosaic.version = 11 : i64} {
  func.func @kernel(%arg0: i32, %arg1: i32, %arg2: memref<8x17xbf16, #tpu.memory_space<vmem>>, %arg3: memref<17x1024xbf16, #tpu.memory_space<vmem>>, %arg4: memref<24x128xf32, #tpu.memory_space<vmem>>, %arg5: memref<8x128xf32, #tpu.memory_space<vmem>>) attributes {dimension_semantics = [#tpu.dimension_semantics<parallel>, #tpu.dimension_semantics<parallel>], iteration_bounds = array<i64: 2, 1>, scalar_prefetch = 0 : i64, scratch_operands = 0 : i64, tpu.core_type = #tpu.core_type<tc>, window_params = [{transform_indices = @transform_0, window_bounds = array<i64: 8, 17>}, {transform_indices = @transform_1, window_bounds = array<i64: 17, 1024>}, {transform_indices = @transform_2, window_bounds = array<i64: 24, 128>}, {transform_indices = @transform_3, window_bounds = array<i64: 8, 128>}]} {
    %c0 = arith.constant 0 : index
    %c0_0 = arith.constant 0 : index
    %0 = vector.load %arg2[%c0, %c0_0] : memref<8x17xbf16, #tpu.memory_space<vmem>>, vector<8x17xbf16>
    %c0_1 = arith.constant 0 : index
    %c0_2 = arith.constant 0 : index
    %1 = vector.load %arg3[%c0_1, %c0_2] : memref<17x1024xbf16, #tpu.memory_space<vmem>>, vector<17x1024xbf16>
    %cst = arith.constant dense<0.000000e+00> : vector<8x1024xf32>
    %2 = tpu.matmul %0, %1, %cst {dimension_numbers = #tpu.dot_dimension_numbers<[1], [0], [0], [1], [0, 0, 1, 1], [], []>} : vector<8x17xbf16>, vector<17x1024xbf16>, vector<8x1024xf32> -> vector<8x1024xf32>
    %cst_3 = arith.constant 0.000000e+00 : f32
    %3 = vector.broadcast %cst_3 : f32 to vector<8x1024xf32>
    %4 = arith.maximumf %2, %3 : vector<8x1024xf32>
    %c20 = arith.constant 20 : index
    %c0_4 = arith.constant 0 : index
    %5 = vector.load %arg4[%c20, %c0_4] : memref<24x128xf32, #tpu.memory_space<vmem>>, vector<1x128xf32>
    %c16 = arith.constant 16 : index
    %c0_5 = arith.constant 0 : index
    %6 = vector.load %arg4[%c16, %c0_5] : memref<24x128xf32, #tpu.memory_space<vmem>>, vector<1x128xf32>
    %7 = vector.extract_strided_slice %4 {offsets = [0, 0], sizes = [8, 128], strides = [1, 1]} : vector<8x1024xf32> to vector<8x128xf32>
    %c0_6 = arith.constant 0 : index
    %c0_7 = arith.constant 0 : index
    %8 = vector.load %arg4[%c0_6, %c0_7] : memref<24x128xf32, #tpu.memory_space<vmem>>, vector<1x128xf32>
    %9 = vector.broadcast %8 : vector<1x128xf32> to vector<8x128xf32>
    %10 = arith.mulf %7, %9 : vector<8x128xf32>
    %11 = vector.broadcast %6 : vector<1x128xf32> to vector<8x128xf32>
    %12 = arith.addf %11, %10 : vector<8x128xf32>
    %13 = vector.extract_strided_slice %4 {offsets = [0, 128], sizes = [8, 128], strides = [1, 1]} : vector<8x1024xf32> to vector<8x128xf32>
    %c2 = arith.constant 2 : index
    %c0_8 = arith.constant 0 : index
    %14 = vector.load %arg4[%c2, %c0_8] : memref<24x128xf32, #tpu.memory_space<vmem>>, vector<1x128xf32>
    %15 = vector.broadcast %14 : vector<1x128xf32> to vector<8x128xf32>
    %16 = arith.mulf %13, %15 : vector<8x128xf32>
    %17 = arith.addf %12, %16 : vector<8x128xf32>
    %18 = vector.extract_strided_slice %4 {offsets = [0, 256], sizes = [8, 128], strides = [1, 1]} : vector<8x1024xf32> to vector<8x128xf32>
    %c4 = arith.constant 4 : index
    %c0_9 = arith.constant 0 : index
    %19 = vector.load %arg4[%c4, %c0_9] : memref<24x128xf32, #tpu.memory_space<vmem>>, vector<1x128xf32>
    %20 = vector.broadcast %19 : vector<1x128xf32> to vector<8x128xf32>
    %21 = arith.mulf %18, %20 : vector<8x128xf32>
    %22 = arith.addf %17, %21 : vector<8x128xf32>
    %23 = vector.extract_strided_slice %4 {offsets = [0, 384], sizes = [8, 128], strides = [1, 1]} : vector<8x1024xf32> to vector<8x128xf32>
    %c6 = arith.constant 6 : index
    %c0_10 = arith.constant 0 : index
    %24 = vector.load %arg4[%c6, %c0_10] : memref<24x128xf32, #tpu.memory_space<vmem>>, vector<1x128xf32>
    %25 = vector.broadcast %24 : vector<1x128xf32> to vector<8x128xf32>
    %26 = arith.mulf %23, %25 : vector<8x128xf32>
    %27 = arith.addf %22, %26 : vector<8x128xf32>
    %28 = vector.extract_strided_slice %4 {offsets = [0, 512], sizes = [8, 128], strides = [1, 1]} : vector<8x1024xf32> to vector<8x128xf32>
    %c8 = arith.constant 8 : index
    %c0_11 = arith.constant 0 : index
    %29 = vector.load %arg4[%c8, %c0_11] : memref<24x128xf32, #tpu.memory_space<vmem>>, vector<1x128xf32>
    %30 = vector.broadcast %29 : vector<1x128xf32> to vector<8x128xf32>
    %31 = arith.mulf %28, %30 : vector<8x128xf32>
    %32 = arith.addf %27, %31 : vector<8x128xf32>
    %33 = vector.extract_strided_slice %4 {offsets = [0, 640], sizes = [8, 128], strides = [1, 1]} : vector<8x1024xf32> to vector<8x128xf32>
    %c10 = arith.constant 10 : index
    %c0_12 = arith.constant 0 : index
    %34 = vector.load %arg4[%c10, %c0_12] : memref<24x128xf32, #tpu.memory_space<vmem>>, vector<1x128xf32>
    %35 = vector.broadcast %34 : vector<1x128xf32> to vector<8x128xf32>
    %36 = arith.mulf %33, %35 : vector<8x128xf32>
    %37 = arith.addf %32, %36 : vector<8x128xf32>
    %38 = vector.extract_strided_slice %4 {offsets = [0, 768], sizes = [8, 128], strides = [1, 1]} : vector<8x1024xf32> to vector<8x128xf32>
    %c12 = arith.constant 12 : index
    %c0_13 = arith.constant 0 : index
    %39 = vector.load %arg4[%c12, %c0_13] : memref<24x128xf32, #tpu.memory_space<vmem>>, vector<1x128xf32>
    %40 = vector.broadcast %39 : vector<1x128xf32> to vector<8x128xf32>
    %41 = arith.mulf %38, %40 : vector<8x128xf32>
    %42 = arith.addf %37, %41 : vector<8x128xf32>
    %43 = vector.extract_strided_slice %4 {offsets = [0, 896], sizes = [8, 128], strides = [1, 1]} : vector<8x1024xf32> to vector<8x128xf32>
    %c14 = arith.constant 14 : index
    %c0_14 = arith.constant 0 : index
    %44 = vector.load %arg4[%c14, %c0_14] : memref<24x128xf32, #tpu.memory_space<vmem>>, vector<1x128xf32>
    %45 = vector.broadcast %44 : vector<1x128xf32> to vector<8x128xf32>
    %46 = arith.mulf %43, %45 : vector<8x128xf32>
    %47 = arith.addf %42, %46 : vector<8x128xf32>
    %cst_15 = arith.constant 0.000000e+00 : f32
    %48 = vector.broadcast %cst_15 : f32 to vector<8x128xf32>
    %49 = arith.maximumf %47, %48 : vector<8x128xf32>
    %c18 = arith.constant 18 : index
    %c0_16 = arith.constant 0 : index
    %50 = vector.load %arg4[%c18, %c0_16] : memref<24x128xf32, #tpu.memory_space<vmem>>, vector<1x128xf32>
    %51 = vector.broadcast %50 : vector<1x128xf32> to vector<8x128xf32>
    %52 = arith.mulf %49, %51 : vector<8x128xf32>
    %53 = vector.broadcast %5 : vector<1x128xf32> to vector<8x128xf32>
    %54 = arith.addf %53, %52 : vector<8x128xf32>
    %c17 = arith.constant 17 : index
    %c0_17 = arith.constant 0 : index
    %55 = vector.load %arg4[%c17, %c0_17] : memref<24x128xf32, #tpu.memory_space<vmem>>, vector<1x128xf32>
    %56 = vector.extract_strided_slice %4 {offsets = [0, 0], sizes = [8, 128], strides = [1, 1]} : vector<8x1024xf32> to vector<8x128xf32>
    %c1 = arith.constant 1 : index
    %c0_18 = arith.constant 0 : index
    %57 = vector.load %arg4[%c1, %c0_18] : memref<24x128xf32, #tpu.memory_space<vmem>>, vector<1x128xf32>
    %58 = vector.broadcast %57 : vector<1x128xf32> to vector<8x128xf32>
    %59 = arith.mulf %56, %58 : vector<8x128xf32>
    %60 = vector.broadcast %55 : vector<1x128xf32> to vector<8x128xf32>
    %61 = arith.addf %60, %59 : vector<8x128xf32>
    %62 = vector.extract_strided_slice %4 {offsets = [0, 128], sizes = [8, 128], strides = [1, 1]} : vector<8x1024xf32> to vector<8x128xf32>
    %c3 = arith.constant 3 : index
    %c0_19 = arith.constant 0 : index
    %63 = vector.load %arg4[%c3, %c0_19] : memref<24x128xf32, #tpu.memory_space<vmem>>, vector<1x128xf32>
    %64 = vector.broadcast %63 : vector<1x128xf32> to vector<8x128xf32>
    %65 = arith.mulf %62, %64 : vector<8x128xf32>
    %66 = arith.addf %61, %65 : vector<8x128xf32>
    %67 = vector.extract_strided_slice %4 {offsets = [0, 256], sizes = [8, 128], strides = [1, 1]} : vector<8x1024xf32> to vector<8x128xf32>
    %c5 = arith.constant 5 : index
    %c0_20 = arith.constant 0 : index
    %68 = vector.load %arg4[%c5, %c0_20] : memref<24x128xf32, #tpu.memory_space<vmem>>, vector<1x128xf32>
    %69 = vector.broadcast %68 : vector<1x128xf32> to vector<8x128xf32>
    %70 = arith.mulf %67, %69 : vector<8x128xf32>
    %71 = arith.addf %66, %70 : vector<8x128xf32>
    %72 = vector.extract_strided_slice %4 {offsets = [0, 384], sizes = [8, 128], strides = [1, 1]} : vector<8x1024xf32> to vector<8x128xf32>
    %c7 = arith.constant 7 : index
    %c0_21 = arith.constant 0 : index
    %73 = vector.load %arg4[%c7, %c0_21] : memref<24x128xf32, #tpu.memory_space<vmem>>, vector<1x128xf32>
    %74 = vector.broadcast %73 : vector<1x128xf32> to vector<8x128xf32>
    %75 = arith.mulf %72, %74 : vector<8x128xf32>
    %76 = arith.addf %71, %75 : vector<8x128xf32>
    %77 = vector.extract_strided_slice %4 {offsets = [0, 512], sizes = [8, 128], strides = [1, 1]} : vector<8x1024xf32> to vector<8x128xf32>
    %c9 = arith.constant 9 : index
    %c0_22 = arith.constant 0 : index
    %78 = vector.load %arg4[%c9, %c0_22] : memref<24x128xf32, #tpu.memory_space<vmem>>, vector<1x128xf32>
    %79 = vector.broadcast %78 : vector<1x128xf32> to vector<8x128xf32>
    %80 = arith.mulf %77, %79 : vector<8x128xf32>
    %81 = arith.addf %76, %80 : vector<8x128xf32>
    %82 = vector.extract_strided_slice %4 {offsets = [0, 640], sizes = [8, 128], strides = [1, 1]} : vector<8x1024xf32> to vector<8x128xf32>
    %c11 = arith.constant 11 : index
    %c0_23 = arith.constant 0 : index
    %83 = vector.load %arg4[%c11, %c0_23] : memref<24x128xf32, #tpu.memory_space<vmem>>, vector<1x128xf32>
    %84 = vector.broadcast %83 : vector<1x128xf32> to vector<8x128xf32>
    %85 = arith.mulf %82, %84 : vector<8x128xf32>
    %86 = arith.addf %81, %85 : vector<8x128xf32>
    %87 = vector.extract_strided_slice %4 {offsets = [0, 768], sizes = [8, 128], strides = [1, 1]} : vector<8x1024xf32> to vector<8x128xf32>
    %c13 = arith.constant 13 : index
    %c0_24 = arith.constant 0 : index
    %88 = vector.load %arg4[%c13, %c0_24] : memref<24x128xf32, #tpu.memory_space<vmem>>, vector<1x128xf32>
    %89 = vector.broadcast %88 : vector<1x128xf32> to vector<8x128xf32>
    %90 = arith.mulf %87, %89 : vector<8x128xf32>
    %91 = arith.addf %86, %90 : vector<8x128xf32>
    %92 = vector.extract_strided_slice %4 {offsets = [0, 896], sizes = [8, 128], strides = [1, 1]} : vector<8x1024xf32> to vector<8x128xf32>
    %c15 = arith.constant 15 : index
    %c0_25 = arith.constant 0 : index
    %93 = vector.load %arg4[%c15, %c0_25] : memref<24x128xf32, #tpu.memory_space<vmem>>, vector<1x128xf32>
    %94 = vector.broadcast %93 : vector<1x128xf32> to vector<8x128xf32>
    %95 = arith.mulf %92, %94 : vector<8x128xf32>
    %96 = arith.addf %91, %95 : vector<8x128xf32>
    %cst_26 = arith.constant 0.000000e+00 : f32
    %97 = vector.broadcast %cst_26 : f32 to vector<8x128xf32>
    %98 = arith.maximumf %96, %97 : vector<8x128xf32>
    %c19 = arith.constant 19 : index
    %c0_27 = arith.constant 0 : index
    %99 = vector.load %arg4[%c19, %c0_27] : memref<24x128xf32, #tpu.memory_space<vmem>>, vector<1x128xf32>
    %100 = vector.broadcast %99 : vector<1x128xf32> to vector<8x128xf32>
    %101 = arith.mulf %98, %100 : vector<8x128xf32>
    %102 = arith.addf %54, %101 : vector<8x128xf32>
    %c0_28 = arith.constant 0 : index
    %c0_29 = arith.constant 0 : index
    %103 = vector.load %arg5[%c0_28, %c0_29] : memref<8x128xf32, #tpu.memory_space<vmem>>, vector<8x128xf32>
    tpu.vector_store %arg5[%c0_28, %c0_29], %102 {strides = array<i32>} : memref<8x128xf32, #tpu.memory_space<vmem>>, vector<8x128xf32>,
    return
  }
  func.func @transform_0(%arg0: i32, %arg1: i32) -> (i32, i32) {
    %c0_i32 = arith.constant 0 : i32
    %c0_i32_0 = arith.constant 0 : i32
    return %arg1, %c0_i32 : i32, i32
  }
  func.func @transform_1(%arg0: i32, %arg1: i32) -> (i32, i32) {
    %c0_i32 = arith.constant 0 : i32
    %c0_i32_0 = arith.constant 0 : i32
    return %c0_i32, %arg0 : i32, i32
  }
  func.func @transform_2(%arg0: i32, %arg1: i32) -> (i32, i32) {
    %c0_i32 = arith.constant 0 : i32
    %c0_i32_0 = arith.constant 0 : i32
    return %c0_i32, %arg0 : i32, i32
  }
  func.func @transform_3(%arg0: i32, %arg1: i32) -> (i32, i32) {
    %c0_i32 = arith.constant 0 : i32
    return %arg1, %arg0 : i32, i32
  }
}

</mosaic_0001>

<bundles_post_ra>
// kernel: tpu_custom_call.1
= control target key start
LH: loop header
LB: loop body
LE: loop exit
PB: predicated region body
PF: predicated region fallthrough
CT: control target
= control target key end

     0   :  { %8 = vsyncpa [#allocation3], 0  ;;  %s1304_s0 = inlined_call_operand.hbm [shape: bf16[8,17], index: 0, kind: input, shape index: {}]   ;;  %s1305_s1 = inlined_call_operand.hbm [shape: bf16[17,2048], index: 1, kind: input, shape index: {}]   ;;  %s1306_s2 = inlined_call_operand.hbm [shape: f32[24,256], index: 2, kind: input, shape index: {}]   ;;  %s1307_s3 = inlined_call_operand.hbm [shape: f32[8,256], index: 3, kind: output, shape index: {}]  }
   0x1   :  { %9 = vsyncpa [#allocation6], 0 }
   0x2   :  { %11 = vsyncpa [#allocation6 + $0x1], 0 }
   0x3   :  { %12 = vsyncpa [#allocation4], 0 }
   0x4   :  { %14 = vsyncpa [#allocation4 + $0x1], 0  ;;  %s1076_s12 = smov 0   ;;  %s1078_s13 = smov 0  }
   0x5   :  { %s1080_s14 = smov 0   ;;  %s1082_s15 = smov 0  }
   0x6   :  { %s1084_s16 = smov 0   ;;  %s1086_s17 = smov 0  }
   0x7 LB: > { %s32_s18 = sadd.s32 1, %s1042_s16  ;;  %s65_s19 = sadd.s32 1, %s1034_s14  ;;  %s1046_s17 = sphi %s1086_s17, %s20_s17   ;;  %s1042_s16 = sphi %s1084_s16, %s1317_s16   ;;  %s1038_s15 = sphi %s1082_s15, %s1316_s15   ;;  %s1034_s14 = sphi %s1080_s14, %s1315_s14   ;;  %s1030_s13 = sphi %s1078_s13, %s1314_s13   ;;  %s1026_s12 = sphi %s1076_s12, %s1313_s12  }
   0x8   : > { %p34_p0 = scmp.ge.s32.totalorder %s32_s18, 2  ;;  %p72_p1 = scmp.ne.s32.totalorder %s1034_s14, %s1030_s13 }
   0x9   : > { %p73_p2 = scmp.eq.s32.totalorder %s1046_s17, 0  ;;  %p700_p3 = scmp.ge.s32.totalorder %s1046_s17, 2 }
   0xa   : > { %s1319_s18 = smov (%p34_p0, %s32_s18), 0  ;;  %p790_p5 = scmp.lt.s32.totalorder %s1046_s17, 2 }
   0xb   : > { %p74_p4 = por %p73_p2, %p72_p1  ;;  %s62_s20 = ssub.s32 %s1042_s16, %s1319_s18 }
   0xc   : > { %s170_s21 = sand.u32 1, %s1046_s17   ;;  %p63_p6 = scmp.eq.s32.totalorder %s62_s20, 0 }
   0xd   : > { %s172_s22 = sand.u32 1, %s1034_s14   ;;  %s751_s23 = sshll.u32 %s1042_s16, 5 }
   0xe   : > { %s1124_s24 = scalar_select %p63_p6, %s1034_s14, %s65_s19  }
   0xf   : > { %s760_s25 = smul.u32 96, %s172_s22  ;;  %s179_s28 = scalar_lea.hbm %s1305_s1, %s751_s23 }
  0x10   : > { %s180_s29 = sshll.u32 %s179_s28, 4  ;;  %p1129_p7 = pnand %p790_p5, %p74_p4  ;;  %s181_s29 = int_to_ptr.hbm [resolvable:$true] %s180_s29 }
  0x11   : > { %s174_s4 = scalar_lea.vmem [#allocation5], %s760_s25  ;;  %s1133_s6 = scalar_lea.sflag [#allocation6], %s170_s21 }
  0x12   : > { %s182_s5 = sshll.u32 %s174_s4, 4  ;;  %s1048_s7 = smov 1024   ;;  %s183_s5 = int_to_ptr.vmem [resolvable:$true] %s182_s5 }
  0x13   : > { %s1049_s8 = smov 512   ;;  %s1050_s9 = smov 32  }
  0x14   : > { %781 = dma.hbm_to_vmem [thread:$0]  (!%p1129_p7), %s181_s29, 1536, %s183_s5, %s1133_s6, %s1048_s7, %s1049_s8, %s1050_s9  }
  0x15   : > { %s761_s10 = smul.u32 24, %s172_s22  ;;  %s1141_s20 = sadd.s32 4294967295, %s1046_s17  }
  0x16   : > { %s697_s21 = sadd.s32 4294967294, %s1046_s17   ;;  %p78_p8 = scmp.ne.s32.totalorder %s1030_s13, %s1026_s12 }
  0x17   : > { %s196_s11 = scalar_lea.vmem [#allocation7], %s761_s10  ;;  %p79_p9 = scmp.eq.s32.totalorder %s1141_s20, 0 }
  0x18   : > { %s1138_s19 = sshll.u32 %s196_s11, 4  ;;  %p130_p10 = scmp.eq.s32.totalorder %s1141_s20, 1  ;;  %s204_s19 = int_to_ptr.vmem [resolvable:$true] %s1138_s19 }
  0x19   : > { %p136_p11 = scmp.eq.s32.totalorder %s697_s21, 1  ;;  %p698_p12 = scmp.ge.s32.totalorder %s1046_s17, 1 }
  0x1a   : > { %p1151_p13 = por %p79_p9, %p78_p8  ;;  %p1158_p0 = por %p130_p10, %p72_p1 }
  0x1b   : > { %p1162_p2 = por %p136_p11, %p78_p8  ;;  %p143_p4 = scmp.lt.s32.totalorder %s1046_s17, 3 }
  0x1c   : > { %s157_s28 = sshll.u32 %s1304_s0, 4  ;;  %s703_s4 = sshll.u32 %s1042_s16, 3  ;;  %s158_s28 = int_to_ptr.hbm [resolvable:$true] %s157_s28 }
  0x1d   : > { %p1170_p5 = pnand %p698_p12, %p143_p4  ;;  %s1051_s5 = smov [#allocation2]  }
  0x1e   : > { %s159_s7 = sshll.u32 %s1051_s5, 4  ;;  %s200_s10 = scalar_lea.hbm %s1306_s2, %s703_s4  ;;  %s160_s7 = int_to_ptr.vmem [resolvable:$true] %s159_s7 }
  0x1f   : > { %p774_p1 = pneg %p1170_p5  ;;  %s201_s11 = sshll.u32 %s200_s10, 4  ;;  %s202_s11 = int_to_ptr.hbm [resolvable:$true] %s201_s11 }
  0x20   : > { %s1052_s21 = smov 256   ;;  %s1053_s26 = smov 128  }
  0x21   : > { %p775_p6 = pnand %p774_p1, %p79_p9  ;;  %s1054_s27 = smov 8  }
  0x22   : > { %784 = dma.hbm_to_vmem [thread:$0]  (!%p1129_p7), %s202_s11, 384, %s204_s19, %s1133_s6, %s1052_s21, %s1053_s26, %s1054_s27  }
  0x23   : > { %777 = dma.hbm_to_vmem [thread:$0]  (!%p775_p6), %s158_s28, 64, %s160_s7, [#allocation3]  }
  0x24   : > { %215 = sbr.rel (%p1170_p5) target bundleno = 229 (0xe5), region = 32 }
  0x29   : > { %1013 = dma.done.wait (%p79_p9), [#allocation3], 64  }
  0x2a   : > { %1015 = vsyncadd (%p79_p9), [#allocation3], 4294967232  ;;  %s222_s4 = sand.u32 1, %s1141_s20   ;;  %s1194_s5 = sand.u32 1, %s1030_s13  }
  0x2b   : > { %s762_s28 = smul.u32 96, %s1194_s5  ;;  %s223_s7 = scalar_lea.sflag [#allocation6], %s222_s4 }
  0x2d   : > { %s1197_s30 = scalar_lea.vmem [#allocation5], %s762_s28 }
  0x2e   : > { %1017 = dma.done.wait (%p1151_p13), %s223_s7, 1920  }
  0x2f   : > { %1019 = vsyncadd (%p1151_p13), %s223_s7, 4294965376  ;;  %vm344_vm0 = vcmask 1040384   ;;  %v276_v0 = vld [vmem:[%s1197_s30 + $0x40] sm:$0x11]  ;;  %v277_v1 = vld [vmem:[%s1197_s30 + $0x48] sm:$0x11] }
  0x30   : > { %v308_v2 = vunpack.c.l.b16 %v276_v0  ;;  %v309_v3 = vunpack.c.h.b16 %v276_v0  ;;  %v310_v4 = vunpack.c.l.b16 %v277_v1  ;;  %v311_v5 = vunpack.c.h.b16 %v277_v1  ;;  %v709_v8 = vld [vmem:[%s1197_s30] sm:$0xf]  ;;  %s763_s6 = smul.u32 24, %s1194_s5  ;;  %v752_v14 = vld [vmem:[%s1197_s30 + $0x4] sm:$0xf]  ;;  %s706_s20 = sshll.u32 %s1194_s5, 3 }
  0x31   : > { %v1055_v6 = vmov 0   ;;  %v756_v9 = vld [vmem:[%s1197_s30 + $0x1c] sm:$0xf0]  ;;  %v711_v15 = vld [vmem:[%s1197_s30 + $0x20] sm:$0xf0]  ;;  %vm340_vm1 = vcmask 138240  }
  0x32   : > { %v1205_v7 = vsel %vm344_vm0, 65535, %v1055_v6  ;;  %v324_v10 = vpack.c.b16 %v308_v2, %v308_v2  ;;  %v325_v11 = vpack.c.b16 %v309_v3, %v309_v3  ;;  %v326_v12 = vpack.c.b16 %v310_v4, %v310_v4  ;;  %v279_v16 = vld [vmem:[%s1197_s30 + $0x58] sm:$0x11]  ;;  %v717_v17 = vld [vmem:[%s1197_s30 + $0x8] sm:$0xf]  ;;  %s1222_s19 = scalar_lea.vmem [#allocation7], %s763_s6 }
  0x33   : > { %v327_v13 = vpack.c.b16 %v311_v5, %v311_v5  ;;  %v757_v18 = vld [vmem:[%s1197_s30 + $0x24] sm:$0xf0]  ;;  %v314_v19 = vunpack.c.l.b16 %v279_v16  ;;  %v278_v20 = vld [vmem:[%s1197_s30 + $0x50] sm:$0x11]  ;;  %v315_v21 = vunpack.c.h.b16 %v279_v16  ;;  %v753_v26 = vld [vmem:[%s1197_s30 + $0xc] sm:$0xf]  ;;  %v710_v31 = vor.u32 %v756_v9, %v709_v8 }
  0x34   : > { %v348_v22 = vand.u32 %v1205_v7, %v324_v10  ;;  %v351_v23 = vand.u32 %v1205_v7, %v325_v11  ;;  %v354_v24 = vand.u32 %v1205_v7, %v326_v12  ;;  %v719_v27 = vld [vmem:[%s1197_s30 + $0x28] sm:$0xf0]  ;;  %v312_v29 = vunpack.c.l.b16 %v278_v20  ;;  %v733_v37 = vld [vmem:[%s1197_s30 + $0x18] sm:$0xf]  ;;  %v725_v39 = vld [vmem:[%s1197_s30 + $0x10] sm:$0xf] }
  0x35   : > { %v357_v25 = vand.u32 %v1205_v7, %v327_v13  ;;  %v330_v28 = vpack.c.b16 %v314_v19, %v314_v19  ;;  %v313_v30 = vunpack.c.h.b16 %v278_v20  ;;  %v714_v32 = vor.u32 %v752_v14, %v711_v15  ;;  %v759_v38 = vld [vmem:[%s1197_s30 + $0x34] sm:$0xf0]  ;;  %v758_v40 = vld [vmem:[%s1197_s30 + $0x2c] sm:$0xf0]  ;;  %v267_v41 = vld [vmem:[#allocation2] sm:$0xf] }
  0x36   : > { %377 = vmatpush.bf16.msra.mxu0 %v348_v22  ;;  %390 = vmatpush.bf16.msra.mxu1 %v351_v23  ;;  %v718_v33 = vor.u32 %v757_v18, %v717_v17  ;;  %v722_v34 = vor.u32 %v753_v26, %v719_v27  ;;  %v328_v35 = vpack.c.b16 %v312_v29, %v312_v29  ;;  %v755_v45 = vld [vmem:[%s1197_s30 + $0x1c] sm:$0xf]  ;;  %v754_v47 = vld [vmem:[%s1197_s30 + $0x14] sm:$0xf]  ;;  %v849_v55 = vld [vmem:[%s1222_s19] ss:$0 sm:$0xff] }
  0x37   : > { %403 = vmatpush.bf16.msra.mxu2 %v354_v24  ;;  %416 = vmatpush.bf16.msra.mxu3 %v357_v25  ;;  %v331_v36 = vpack.c.b16 %v315_v21, %v315_v21  ;;  %v366_v42 = vand.u32 %v1205_v7, %v330_v28  ;;  %v329_v43 = vpack.c.b16 %v313_v30, %v313_v30  ;;  %v735_v46 = vld [vmem:[%s1197_s30 + $0x38] sm:$0xf0]  ;;  %v727_v48 = vld [vmem:[%s1197_s30 + $0x30] sm:$0xf0]  ;;  %v851_v56 = vld [vmem:[%s1222_s19 + $0x1] ss:$0 sm:$0xff] }
  0x38   : > { %v360_v44 = vand.u32 %v1205_v7, %v328_v35  ;;  %v734_v51 = vor.u32 %v759_v38, %v733_v37  ;;  %v726_v52 = vor.u32 %v758_v40, %v725_v39  ;;  %v738_v53 = vor.u32 %v755_v45, %v735_v46  ;;  %v850_v60 = vld [vmem:[%s1222_s19 + $0x10] ss:$0 sm:$0xff]  ;;  %v853_v62 = vld [vmem:[%s1222_s19 + $0x2] ss:$0 sm:$0xff]  ;;  %v852_v1 = vld [vmem:[%s1222_s19 + $0x11] ss:$0 sm:$0xff] }
  0x39   : > { %v369_v49 = vand.u32 %v1205_v7, %v331_v36  ;;  %v363_v50 = vand.u32 %v1205_v7, %v329_v43  ;;  %v730_v54 = vor.u32 %v754_v47, %v727_v48  ;;  %v854_v2 = vld [vmem:[%s1222_s19 + $0x3] ss:$0 sm:$0xff]  ;;  %v855_v8 = vld [vmem:[%s1222_s19 + $0x4] ss:$0 sm:$0xff]  ;;  %v856_v9 = vld [vmem:[%s1222_s19 + $0x5] ss:$0 sm:$0xff] }
  0x3a   : > { %378 = vmatpush.bf16.msra.mxu0 %v710_v31  ;;  %391 = vmatpush.bf16.msra.mxu1 %v714_v32  ;;  %v857_v19 = vld [vmem:[%s1222_s19 + $0x6] ss:$0 sm:$0xff]  ;;  %v858_v20 = vld [vmem:[%s1222_s19 + $0x7] ss:$0 sm:$0xff]  ;;  %v859_v27 = vld [vmem:[%s1222_s19 + $0x8] ss:$0 sm:$0xff] }
  0x3b   : > { %404 = vmatpush.bf16.msra.mxu2 %v718_v33  ;;  %417 = vmatpush.bf16.msra.mxu3 %v722_v34  ;;  %v860_v28 = vld [vmem:[%s1222_s19 + $0x9] ss:$0 sm:$0xff]  ;;  %v861_v33 = vld [vmem:[%s1222_s19 + $0xa] ss:$0 sm:$0xff]  ;;  %v862_v34 = vld [vmem:[%s1222_s19 + $0xb] ss:$0 sm:$0xff] }
  0x3c   : > { %v863_v43 = vld [vmem:[%s1222_s19 + $0xc] ss:$0 sm:$0xff]  ;;  %v865_v45 = vld [vmem:[%s1222_s19 + $0xe] ss:$0 sm:$0xff]  ;;  %v868_v46 = vld [vmem:[%s1222_s19 + $0xf] ss:$0 sm:$0xff] }
  0x3d   : > { %739 = vmatmul.msk.bf16.vlgmr.msra.gmra.mxu0 %vm340_vm1, %v267_v41  ;;  %740 = vmatmul.msk.bf16.vlgmr.msra.gmra.mxu1 %vm340_vm1, %v267_v41  ;;  %s748_s23 = sshll.u32 %s1038_s15, 3  ;;  %s264_s10 = scalar_lea.vmem [#allocation8], %s706_s20 }
  0x3e   : > { %429 = vmatpush.bf16.msrb.mxu0 %v360_v44  ;;  %741 = vmatmul.msk.bf16.vlgmr.msra.gmra.mxu2 %vm340_vm1, %v267_v41  ;;  %v864_v44 = vld [vmem:[%s1222_s19 + $0xd] ss:$0 sm:$0xff]  ;;  %s577_s9 = scalar_lea.hbm %s1307_s3, %s748_s23  ;;  %s579_s11 = sshll.u32 %s264_s10, 4  ;;  %s580_s11 = int_to_ptr.vmem [resolvable:$true] %s579_s11 }
  0x3f   : > { %455 = vmatpush.bf16.msrb.mxu2 %v366_v42  ;;  %742 = vmatmul.msk.bf16.vlgmr.msra.gmra.mxu3 %vm340_vm1, %v267_v41  ;;  %s581_s21 = sshll.u32 %s577_s9, 4  ;;  %s565_s15 = scalar_lea.sflag [#allocation4], %s1194_s5  ;;  %s582_s21 = int_to_ptr.hbm [resolvable:$true] %s581_s21 }
  0x40   : > { %468 = vmatpush.bf16.msrb.mxu3 %v369_v49  ;;  %442 = vmatpush.bf16.msrb.mxu1 %v363_v50  ;;  %s974_s26 = sshra.s32 %s582_s21, 4  ;;  %s980_s7 = scalar_lea.hbm %s1307_s3, 16  ;;  %s975_s26 = int_to_ptr.hbm [resolvable:$true] %s974_s26 }
  0x41   : > { %s976_s27 = scalar_lea.hbm %s975_s26, 8  ;;  %p981_p10 = scmp.lt.s32.totalorder %s975_s26, %s1307_s3 }
  0x42   : > { %430 = vmatpush.bf16.msrb.mxu0 %v726_v52  ;;  %p977_p7 = scmp.ne.s32.totalorder %s975_s26, %s976_s27  ;;  %p982_p11 = scmp.lt.s32.totalorder %s980_s7, %s976_s27 }
  0x43   : > { %456 = vmatpush.bf16.msrb.mxu2 %v734_v51 }
  0x44   : > { %469 = vmatpush.bf16.msrb.mxu3 %v738_v53  ;;  %443 = vmatpush.bf16.msrb.mxu1 %v730_v54  ;;  %p978_p8 = pnand %p977_p7, %p1158_p0  ;;  %p983_p12 = por %p982_p11, %p981_p10 }
  0x46   : > { %p979_p9 = pneg %p978_p8 }
  0x48   : > { %p984_p13 = pnand %p983_p12, %p979_p9 }
  0x4d   : > { %743 = vmatmul.msk.bf16.vlgmr.msrb.gmra.mxu0 %vm340_vm1, %v267_v41  ;;  %744 = vmatmul.msk.bf16.vlgmr.msrb.gmra.mxu1 %vm340_vm1, %v267_v41 }
  0x4e   : > { %745 = vmatmul.msk.bf16.vlgmr.msrb.gmra.mxu2 %vm340_vm1, %v267_v41 }
  0x4f   : > { %746 = vmatmul.msk.bf16.vlgmr.msrb.gmra.mxu3 %vm340_vm1, %v267_v41 }
  0xba   : > { %v380_v57 = vpop.f32.mrf.mxu0  ;;  %v393_v58 = vpop.f32.mrf.mxu1 }
  0xbb   : > { %v475_v59 = vmax.f32 %v380_v57, 0.0  ;;  %v476_v61 = vmax.f32 %v393_v58, 0.0 }
  0xbd   : > { %v487_v63 = vmul.f32 %v849_v55, %v475_v59  ;;  %v527_v0 = vmul.f32 %v851_v56, %v475_v59  ;;  %v492_v4 = vmul.f32 %v853_v62, %v476_v61  ;;  %v532_v6 = vmul.f32 %v854_v2, %v476_v61  ;;  %v866_v62 = vld [vmem:[%s1222_s19 + $0x12] ss:$0 sm:$0xff] }
  0xbf   : > { %v489_v3 = vadd.f32 %v850_v60, %v487_v63  ;;  %v529_v5 = vadd.f32 %v852_v1, %v527_v0 }
  0xc1   : > { %v406_v7 = vpop.f32.mrf.mxu2  ;;  %v493_v14 = vadd.f32 %v492_v4, %v489_v3  ;;  %v533_v15 = vadd.f32 %v532_v6, %v529_v5  ;;  %v867_v3 = vld [vmem:[%s1222_s19 + $0x14] ss:$0 sm:$0xff]  ;;  %v869_v5 = vld [vmem:[%s1222_s19 + $0x13] ss:$0 sm:$0xff] }
  0xc2   : > { %v419_v10 = vpop.f32.mrf.mxu3  ;;  %v477_v11 = vmax.f32 %v406_v7, 0.0  ;;  %v382_v12 = vpop.f32.mrf.mxu0 }
  0xc3   : > { %v395_v13 = vpop.f32.mrf.mxu1  ;;  %v478_v18 = vmax.f32 %v419_v10, 0.0 }
  0xc4   : > { %v496_v16 = vmul.f32 %v855_v8, %v477_v11  ;;  %v536_v17 = vmul.f32 %v856_v9, %v477_v11 }
  0xc5   : > { %v500_v23 = vmul.f32 %v857_v19, %v478_v18  ;;  %v540_v24 = vmul.f32 %v858_v20, %v478_v18 }
  0xc6   : > { %v497_v21 = vadd.f32 %v496_v16, %v493_v14  ;;  %v537_v22 = vadd.f32 %v536_v17, %v533_v15 }
  0xc8   : > { %v501_v35 = vadd.f32 %v500_v23, %v497_v21  ;;  %v541_v36 = vadd.f32 %v540_v24, %v537_v22 }
  0xc9   : > { %v408_v25 = vpop.f32.mrf.mxu2 }
  0xca   : > { %v421_v26 = vpop.f32.mrf.mxu3  ;;  %v432_v29 = vpop.f32.mrf.mxu0 }
  0xcb   : > { %v445_v30 = vpop.f32.mrf.mxu1  ;;  %v479_v31 = vmax.f32 %v432_v29, 0.0 }
  0xcc   : > { %v480_v32 = vmax.f32 %v445_v30, 0.0 }
  0xcd   : > { %v504_v37 = vmul.f32 %v859_v27, %v479_v31  ;;  %v544_v38 = vmul.f32 %v860_v28, %v479_v31 }
  0xce   : > { %v508_v41 = vmul.f32 %v861_v33, %v480_v32  ;;  %v548_v42 = vmul.f32 %v862_v34, %v480_v32 }
  0xcf   : > { %v505_v39 = vadd.f32 %v504_v37, %v501_v35  ;;  %v545_v40 = vadd.f32 %v544_v38, %v541_v36 }
  0xd1   : > { %v458_v47 = vpop.f32.mrf.mxu2  ;;  %v509_v53 = vadd.f32 %v508_v41, %v505_v39  ;;  %v549_v54 = vadd.f32 %v548_v42, %v545_v40 }
  0xd2   : > { %v471_v48 = vpop.f32.mrf.mxu3  ;;  %v481_v49 = vmax.f32 %v458_v47, 0.0  ;;  %v434_v51 = vpop.f32.mrf.mxu0 }
  0xd3   : > { %v482_v50 = vmax.f32 %v471_v48, 0.0  ;;  %v447_v52 = vpop.f32.mrf.mxu1 }
  0xd4   : > { %v512_v55 = vmul.f32 %v863_v43, %v481_v49  ;;  %v552_v56 = vmul.f32 %v864_v44, %v481_v49 }
  0xd5   : > { %v516_v57 = vmul.f32 %v865_v45, %v482_v50  ;;  %v556_v58 = vmul.f32 %v868_v46, %v482_v50 }
  0xd6   : > { %v513_v59 = vadd.f32 %v512_v55, %v509_v53  ;;  %v553_v60 = vadd.f32 %v552_v56, %v549_v54 }
  0xd8   : > { %v517_v61 = vadd.f32 %v516_v57, %v513_v59  ;;  %v557_v63 = vadd.f32 %v556_v58, %v553_v60 }
  0xd9   : > { %v460_v0 = vpop.f32.mrf.mxu2 }
  0xda   : > { %v473_v1 = vpop.f32.mrf.mxu3  ;;  %v518_v2 = vmax.f32 %v517_v61, 0.0  ;;  %v558_v4 = vmax.f32 %v557_v63, 0.0 }
  0xdc   : > { %v521_v6 = vmul.f32 %v866_v62, %v518_v2  ;;  %v561_v8 = vmul.f32 %v869_v5, %v558_v4 }
  0xde   : > { %v523_v7 = vadd.f32 %v867_v3, %v521_v6 }
  0xe0   : > { %v562_v9 = vadd.f32 %v561_v8, %v523_v7 }
  0xe2   : > { %563 = vst [vmem:[%s264_s10] sm:$0xff] %v562_v9 }
  0xe3   : > { %987 = shalt.err (!%p984_p13)
}
  0xe4   : > { %772 = dma.vmem_to_hbm [thread:$0]  (%p1158_p0), %s580_s11, 128, %s582_s21, %s565_s15  }
  0xe5 PF: > { %s593_s5 = sand.u32 1, %s1026_s12   ;;  %p786_p4 = pnand %p700_p3, %p1162_p2 }
  0xe6   : > { %s594_s19 = scalar_lea.sflag [#allocation4], %s593_s5 }
  0xe7   : > { %p787_p5 = pneg %p786_p4 }
  0xe9   : > { %1021 = dma.done.wait (%p787_p5), %s594_s19, 128  }
  0xea   : > { %1023 = vsyncadd (%p787_p5), %s594_s19, 4294967168  ;;  %s20_s17 = sadd.s32 1, %s1046_s17   ;;  %s1313_s12 = smov %s1030_s13 }
  0xeb   : > { %p17_p1 = scmp.ge.s32.totalorder %s20_s17, 4   ;;  %s1314_s13 = smov %s1034_s14 }
  0xec   : > { %s1315_s14 = smov %s1124_s24  ;;  %s1316_s15 = smov %s1042_s16 }
  0xed   : > { %s1317_s16 = smov %s1319_s18  ;;  %19 = sbr.rel (!%p17_p1) target bundleno = 7 (0x7), region = 94 }
  0xf2   :  { %600 = vsyncpa [#allocation3], 1 }
  0xf3   :  { %602 = vsyncpa [#allocation3 + $0x1], 1 }
  0xf4   :  { %603 = vsyncpa [#allocation6], 1 }
  0xf5   :  { %605 = vsyncpa [#allocation6 + $0x1], 1 }
  0xf6   :  { %606 = vsyncpa [#allocation4], 1 }
  0xf7   :  { %608 = vsyncpa [#allocation4 + $0x1], 1 }

</bundles_post_ra>
